<compile_context>
chip_gen: v5e
topology: v5e:2x2
jax: 0.10.0
libtpu: 0.0.40
codegen_flags: <defaults>
</compile_context>

<pallas_src>
import functools

import jax
import jax.numpy as jnp
from jax.experimental import pallas as pl
from jax.experimental.pallas import tpu as pltpu

LANES = 128
SUBLANES = 8             # f32 sublane tile; in-kernel reshape granularity
MAX_BLOCK_ROWS = 4096    # 4096 x 128 f32 = 2 MiB per input block (8 MiB dbl-buffered)
SMOOTH = 1.0


def _min_sublanes(dtype) -> int:
    # Min sublane tile for a dtype: 8 (32-bit), 16 (16-bit), 32 (8-bit).
    return SUBLANES * max(1, 4 // jnp.dtype(dtype).itemsize)


def _dice_partial_kernel(x_ref, t_ref, part_ref, acc_i, acc_x, acc_t,
                         *, block_rows, nsteps, last_rows):
    i = pl.program_id(0)

    # Zero the vector accumulators on the first grid step.
    @pl.when(i == 0)
    def _init():
        acc_i[...] = jnp.zeros_like(acc_i)
        acc_x[...] = jnp.zeros_like(acc_x)
        acc_t[...] = jnp.zeros_like(acc_t)

    def _accumulate(valid_rows):
        xr = x_ref[...].astype(jnp.float32)
        # sigmoid(x) = 0.5 * (tanh(x/2) + 1): one EUP push per vreg (vs exp+recip).
        x = 0.5 * (jnp.tanh(0.5 * xr) + 1.0)
        t = t_ref[...].astype(jnp.float32)
        if valid_rows is not None:
            # Partial last block: rows >= valid_rows hold undefined VMEM garbage
            # (possibly NaN); where() zeroes their contribution. Only compiled
            # into the last-step branch, so it is not in the hot loop.
            ridx = jax.lax.broadcasted_iota(jnp.int32, (block_rows, LANES), 0)
            m = ridx < valid_rows
            x = jnp.where(m, x, 0.0)
            t = jnp.where(m, t, 0.0)
        # Reduce only along the leading (vreg-index) axis: pure VPU vreg adds.
        # The expensive cross-sublane/lane XLU reduction happens once, at the end.
        acc_i[...] = acc_i[...] + (x * t).reshape(-1, SUBLANES, LANES).sum(axis=0)
        acc_x[...] = acc_x[...] + x.reshape(-1, SUBLANES, LANES).sum(axis=0)
        acc_t[...] = acc_t[...] + t.reshape(-1, SUBLANES, LANES).sum(axis=0)

    if last_rows == block_rows:
        # Grid divides evenly: unmasked hot path on every step.
        _accumulate(None)
    else:
        @pl.when(i < nsteps - 1)
        def _hot():
            _accumulate(None)

        @pl.when(i == nsteps - 1)
        def _tail():
            _accumulate(last_rows)

    # Finalize: one cross-sublane/lane reduction per accumulator, on the last step.
    @pl.when(i == nsteps - 1)
    def _fin():
        part_ref[0] = jnp.sum(acc_i[...])
        part_ref[1] = jnp.sum(acc_x[...])
        part_ref[2] = jnp.sum(acc_t[...])


def dice_loss(inputs, targets, smooth=SMOOTH):
    """Pallas implementation of DiceLoss.forward(inputs, targets, smooth=1)."""
    x_flat = inputs.reshape(-1)
    t_flat = targets.reshape(-1)
    n = x_flat.shape[0]

    # Align the kernel region to both inputs' min (sublane x 128) tiles so no
    # padding copy is ever needed; the remainder is reduced in plain JAX.
    sub = max(_min_sublanes(x_flat.dtype), _min_sublanes(t_flat.dtype))
    align = sub * LANES
    n_aligned = (n // align) * align
    n_tail = n - n_aligned

    if n_aligned == 0:
        # Degenerate tiny input: nothing for the kernel to do.
        p = jax.nn.sigmoid(x_flat.astype(jnp.float32))
        t = t_flat.astype(jnp.float32)
        inter, sx, st = jnp.sum(p * t), jnp.sum(p), jnp.sum(t)
    else:
        if n_tail:
            x_main, t_main = x_flat[:n_aligned], t_flat[:n_aligned]
        else:
            x_main, t_main = x_flat, t_flat

        rows = n_aligned // LANES                 # multiple of `sub` (>= 8)
        block_rows = min(MAX_BLOCK_ROWS, rows)    # multiple of `sub` either way
        nsteps = pl.cdiv(rows, block_rows)
        last_rows = rows - (nsteps - 1) * block_rows   # valid rows in last block

        x2 = x_main.reshape(rows, LANES)
        t2 = t_main.reshape(rows, LANES)

        kernel = functools.partial(
            _dice_partial_kernel,
            block_rows=block_rows,
            nsteps=nsteps,
            last_rows=last_rows,
        )

        n_kernel = rows * LANES
        bytes_accessed = n_kernel * (x2.dtype.itemsize + t2.dtype.itemsize) + 3 * 4

        parts = pl.pallas_call(
            kernel,
            out_shape=jax.ShapeDtypeStruct((3,), jnp.float32),
            grid=(nsteps,),
            in_specs=[
                pl.BlockSpec((block_rows, LANES), lambda i: (i, 0)),
                pl.BlockSpec((block_rows, LANES), lambda i: (i, 0)),
            ],
            out_specs=pl.BlockSpec(memory_space=pltpu.SMEM),
            scratch_shapes=[
                pltpu.VMEM((SUBLANES, LANES), jnp.float32),   # intersection partials
                pltpu.VMEM((SUBLANES, LANES), jnp.float32),   # sigmoid(x) partials
                pltpu.VMEM((SUBLANES, LANES), jnp.float32),   # target partials
            ],
            compiler_params=pltpu.CompilerParams(
                dimension_semantics=("arbitrary",),   # sequential reduction axis
            ),
            cost_estimate=pl.CostEstimate(
                flops=7 * n_kernel,
                transcendentals=n_kernel,
                bytes_accessed=bytes_accessed,
            ),
        )(x2, t2)

        inter, sx, st = parts[0], parts[1], parts[2]

        if n_tail:
            # < align leftover elements: cheap plain-JAX reduction, no pad copy.
            p_tail = jax.nn.sigmoid(x_flat[n_aligned:].astype(jnp.float32))
            t_tail = t_flat[n_aligned:].astype(jnp.float32)
            inter = inter + jnp.sum(p_tail * t_tail)
            sx = sx + jnp.sum(p_tail)
            st = st + jnp.sum(t_tail)

    dice = (2.0 * inter + smooth) / (sx + st + smooth)
    return 1.0 - dice


if __name__ == "__main__":
    key = jax.random.PRNGKey(0)
    k1, k2 = jax.random.split(key)

    # Small segmentation-style shapes: NCHW logits + binary targets.
    B, C, H, W = 2, 4, 16, 16
    logits = jax.random.normal(k1, (B, C, H, W), dtype=jnp.float32)
    targets = (jax.random.uniform(k2, (B, C, H, W)) > 0.5).astype(jnp.float32)

    loss = dice_loss(logits, targets)
    jax.block_until_ready(loss)

    # Pure-JAX reference check (same math as the PyTorch module).
    p = jax.nn.sigmoid(logits).reshape(-1)
    tt = targets.reshape(-1)
    inter = jnp.sum(p * tt)
    ref = 1.0 - (2.0 * inter + 1.0) / (jnp.sum(p) + jnp.sum(tt) + 1.0)
    assert jnp.allclose(loss, ref, rtol=1e-5, atol=1e-5), (loss, ref)

    print("KERNEL_OK")
</pallas_src>

<mosaic_0001>
module attributes {stable_mosaic.version = 11 : i64} {
  func.func @_dice_partial_kernel(%arg0: i32, %arg1: memref<16x128xf32, #tpu.memory_space<vmem>>, %arg2: memref<16x128xf32, #tpu.memory_space<vmem>>, %arg3: memref<3xf32, #tpu.memory_space<smem>>, %arg4: memref<8x128xf32, #tpu.memory_space<vmem>>, %arg5: memref<8x128xf32, #tpu.memory_space<vmem>>, %arg6: memref<8x128xf32, #tpu.memory_space<vmem>>) attributes {dimension_semantics = [#tpu.dimension_semantics<arbitrary>], iteration_bounds = array<i64: 1>, scalar_prefetch = 0 : i64, scratch_operands = 3 : i64, tpu.core_type = #tpu.core_type<tc>, window_params = [{transform_indices = @transform_0, window_bounds = array<i64: 16, 128>}, {transform_indices = @transform_1, window_bounds = array<i64: 16, 128>}, {transform_indices = @transform_2, window_bounds = array<i64: 3>}]} {
    %c0_i32 = arith.constant 0 : i32
    %0 = arith.cmpi eq, %arg0, %c0_i32 : i32
    %1 = arith.extui %0 : i1 to i32
    %c0_i32_0 = arith.constant 0 : i32
    %2 = arith.cmpi ne, %1, %c0_i32_0 : i32
    scf.if %2 {
      %cst_23 = arith.constant 0.000000e+00 : f32
      %31 = vector.broadcast %cst_23 : f32 to vector<8x128xf32>
      %c0_24 = arith.constant 0 : index
      %c0_25 = arith.constant 0 : index
      %32 = vector.load %arg4[%c0_24, %c0_25] : memref<8x128xf32, #tpu.memory_space<vmem>>, vector<8x128xf32>
      tpu.vector_store %arg4[%c0_24, %c0_25], %31 {strides = array<i32>} : memref<8x128xf32, #tpu.memory_space<vmem>>, vector<8x128xf32>,
      %cst_26 = arith.constant 0.000000e+00 : f32
      %33 = vector.broadcast %cst_26 : f32 to vector<8x128xf32>
      %c0_27 = arith.constant 0 : index
      %c0_28 = arith.constant 0 : index
      %34 = vector.load %arg5[%c0_27, %c0_28] : memref<8x128xf32, #tpu.memory_space<vmem>>, vector<8x128xf32>
      tpu.vector_store %arg5[%c0_27, %c0_28], %33 {strides = array<i32>} : memref<8x128xf32, #tpu.memory_space<vmem>>, vector<8x128xf32>,
      %cst_29 = arith.constant 0.000000e+00 : f32
      %35 = vector.broadcast %cst_29 : f32 to vector<8x128xf32>
      %c0_30 = arith.constant 0 : index
      %c0_31 = arith.constant 0 : index
      %36 = vector.load %arg6[%c0_30, %c0_31] : memref<8x128xf32, #tpu.memory_space<vmem>>, vector<8x128xf32>
      tpu.vector_store %arg6[%c0_30, %c0_31], %35 {strides = array<i32>} : memref<8x128xf32, #tpu.memory_space<vmem>>, vector<8x128xf32>,
    } else {
    }
    %c0 = arith.constant 0 : index
    %c0_1 = arith.constant 0 : index
    %3 = vector.load %arg1[%c0, %c0_1] : memref<16x128xf32, #tpu.memory_space<vmem>>, vector<16x128xf32>
    %cst = arith.constant 5.000000e-01 : f32
    %4 = vector.broadcast %cst : f32 to vector<16x128xf32>
    %5 = arith.mulf %4, %3 : vector<16x128xf32>
    %6 = math.tanh %5 : vector<16x128xf32>
    %cst_2 = arith.constant 1.000000e+00 : f32
    %7 = vector.broadcast %cst_2 : f32 to vector<16x128xf32>
    %8 = arith.addf %6, %7 : vector<16x128xf32>
    %cst_3 = arith.constant 5.000000e-01 : f32
    %9 = vector.broadcast %cst_3 : f32 to vector<16x128xf32>
    %10 = arith.mulf %9, %8 : vector<16x128xf32>
    %c0_4 = arith.constant 0 : index
    %c0_5 = arith.constant 0 : index
    %11 = vector.load %arg2[%c0_4, %c0_5] : memref<16x128xf32, #tpu.memory_space<vmem>>, vector<16x128xf32>
    %c0_6 = arith.constant 0 : index
    %c0_7 = arith.constant 0 : index
    %12 = vector.load %arg4[%c0_6, %c0_7] : memref<8x128xf32, #tpu.memory_space<vmem>>, vector<8x128xf32>
    %13 = arith.mulf %10, %11 : vector<16x128xf32>
    %14 = vector.shape_cast %13 : vector<16x128xf32> to vector<2x8x128xf32>
    %cst_8 = arith.constant dense<0.000000e+00> : vector<8x128xf32>
    %15 = vector.multi_reduction <add>, %14, %cst_8 [0] : vector<2x8x128xf32> to vector<8x128xf32>
    %16 = arith.addf %12, %15 : vector<8x128xf32>
    %c0_9 = arith.constant 0 : index
    %c0_10 = arith.constant 0 : index
    %17 = vector.load %arg4[%c0_9, %c0_10] : memref<8x128xf32, #tpu.memory_space<vmem>>, vector<8x128xf32>
    tpu.vector_store %arg4[%c0_9, %c0_10], %16 {strides = array<i32>} : memref<8x128xf32, #tpu.memory_space<vmem>>, vector<8x128xf32>,
    %c0_11 = arith.constant 0 : index
    %c0_12 = arith.constant 0 : index
    %18 = vector.load %arg5[%c0_11, %c0_12] : memref<8x128xf32, #tpu.memory_space<vmem>>, vector<8x128xf32>
    %19 = vector.shape_cast %10 : vector<16x128xf32> to vector<2x8x128xf32>
    %cst_13 = arith.constant dense<0.000000e+00> : vector<8x128xf32>
    %20 = vector.multi_reduction <add>, %19, %cst_13 [0] : vector<2x8x128xf32> to vector<8x128xf32>
    %21 = arith.addf %18, %20 : vector<8x128xf32>
    %c0_14 = arith.constant 0 : index
    %c0_15 = arith.constant 0 : index
    %22 = vector.load %arg5[%c0_14, %c0_15] : memref<8x128xf32, #tpu.memory_space<vmem>>, vector<8x128xf32>
    tpu.vector_store %arg5[%c0_14, %c0_15], %21 {strides = array<i32>} : memref<8x128xf32, #tpu.memory_space<vmem>>, vector<8x128xf32>,
    %c0_16 = arith.constant 0 : index
    %c0_17 = arith.constant 0 : index
    %23 = vector.load %arg6[%c0_16, %c0_17] : memref<8x128xf32, #tpu.memory_space<vmem>>, vector<8x128xf32>
    %24 = vector.shape_cast %11 : vector<16x128xf32> to vector<2x8x128xf32>
    %cst_18 = arith.constant dense<0.000000e+00> : vector<8x128xf32>
    %25 = vector.multi_reduction <add>, %24, %cst_18 [0] : vector<2x8x128xf32> to vector<8x128xf32>
    %26 = arith.addf %23, %25 : vector<8x128xf32>
    %c0_19 = arith.constant 0 : index
    %c0_20 = arith.constant 0 : index
    %27 = vector.load %arg6[%c0_19, %c0_20] : memref<8x128xf32, #tpu.memory_space<vmem>>, vector<8x128xf32>
    tpu.vector_store %arg6[%c0_19, %c0_20], %26 {strides = array<i32>} : memref<8x128xf32, #tpu.memory_space<vmem>>, vector<8x128xf32>,
    %c0_i32_21 = arith.constant 0 : i32
    %28 = arith.cmpi eq, %arg0, %c0_i32_21 : i32
    %29 = arith.extui %28 : i1 to i32
    %c0_i32_22 = arith.constant 0 : i32
    %30 = arith.cmpi ne, %29, %c0_i32_22 : i32
    scf.if %30 {
      %c0_23 = arith.constant 0 : index
      %c0_24 = arith.constant 0 : index
      %31 = vector.load %arg4[%c0_23, %c0_24] : memref<8x128xf32, #tpu.memory_space<vmem>>, vector<8x128xf32>
      %32 = vector.shape_cast %31 : vector<8x128xf32> to vector<1x8x128xf32>
      %cst_25 = arith.constant dense<0.000000e+00> : vector<1xf32>
      %33 = vector.multi_reduction <add>, %32, %cst_25 [1, 2] : vector<1x8x128xf32> to vector<1xf32>
      %34 = vector.shape_cast %33 : vector<1xf32> to vector<1x1x1xf32>
      %35 = vector.extract %34[0, 0, 0] : f32 from vector<1x1x1xf32>
      %c0_26 = arith.constant 0 : index
      %36 = memref.load %arg3[%c0_26] : memref<3xf32, #tpu.memory_space<smem>>
      memref.store %35, %arg3[%c0_26] : memref<3xf32, #tpu.memory_space<smem>>
      %c0_27 = arith.constant 0 : index
      %c0_28 = arith.constant 0 : index
      %37 = vector.load %arg5[%c0_27, %c0_28] : memref<8x128xf32, #tpu.memory_space<vmem>>, vector<8x128xf32>
      %38 = vector.shape_cast %37 : vector<8x128xf32> to vector<1x8x128xf32>
      %cst_29 = arith.constant dense<0.000000e+00> : vector<1xf32>
      %39 = vector.multi_reduction <add>, %38, %cst_29 [1, 2] : vector<1x8x128xf32> to vector<1xf32>
      %40 = vector.shape_cast %39 : vector<1xf32> to vector<1x1x1xf32>
      %41 = vector.extract %40[0, 0, 0] : f32 from vector<1x1x1xf32>
      %c1 = arith.constant 1 : index
      %42 = memref.load %arg3[%c1] : memref<3xf32, #tpu.memory_space<smem>>
      memref.store %41, %arg3[%c1] : memref<3xf32, #tpu.memory_space<smem>>
      %c0_30 = arith.constant 0 : index
      %c0_31 = arith.constant 0 : index
      %43 = vector.load %arg6[%c0_30, %c0_31] : memref<8x128xf32, #tpu.memory_space<vmem>>, vector<8x128xf32>
      %44 = vector.shape_cast %43 : vector<8x128xf32> to vector<1x8x128xf32>
      %cst_32 = arith.constant dense<0.000000e+00> : vector<1xf32>
      %45 = vector.multi_reduction <add>, %44, %cst_32 [1, 2] : vector<1x8x128xf32> to vector<1xf32>
      %46 = vector.shape_cast %45 : vector<1xf32> to vector<1x1x1xf32>
      %47 = vector.extract %46[0, 0, 0] : f32 from vector<1x1x1xf32>
      %c2 = arith.constant 2 : index
      %48 = memref.load %arg3[%c2] : memref<3xf32, #tpu.memory_space<smem>>
      memref.store %47, %arg3[%c2] : memref<3xf32, #tpu.memory_space<smem>>
    } else {
    }
    return
  }
  func.func @transform_0(%arg0: i32) -> (i32, i32) {
    %c0_i32 = arith.constant 0 : i32
    %c0_i32_0 = arith.constant 0 : i32
    return %arg0, %c0_i32 : i32, i32
  }
  func.func @transform_1(%arg0: i32) -> (i32, i32) {
    %c0_i32 = arith.constant 0 : i32
    %c0_i32_0 = arith.constant 0 : i32
    return %arg0, %c0_i32 : i32, i32
  }
  func.func @transform_2(%arg0: i32) -> i32 {
    %c0_i32 = arith.constant 0 : i32
    %c0_i32_0 = arith.constant 0 : i32
    return %c0_i32 : i32
  }
}

</mosaic_0001>

<bundles_post_ra>
// kernel: tpu_custom_call.1
= control target key start
LH: loop header
LB: loop body
LE: loop exit
PB: predicated region body
PF: predicated region fallthrough
CT: control target
= control target key end

     0   :  { %7 = vsyncpa [#allocation6], 0  ;;  %s243_s0 = inlined_call_operand.hbm [shape: f32[16,128], index: 0, kind: input, shape index: {}]   ;;  %s244_s1 = inlined_call_operand.hbm [shape: f32[16,128], index: 1, kind: input, shape index: {}]   ;;  %s245_s2 = inlined_call_operand.hbm [shape: f32[3], index: 2, kind: output, shape index: {}]  }
   0x1   :  { %8 = vsyncpa [#allocation9], 0 }
   0x2   :  { %9 = vsyncpa [#allocation7], 0  ;;  %s14_s11 = sshll.u32 %s243_s0, 4  ;;  %s214_s12 = smov [#allocation5]   ;;  %s15_s11 = int_to_ptr.hbm [resolvable:$true] %s14_s11 }
   0x3   :  { %s16_s13 = sshll.u32 %s214_s12, 4  ;;  %s27_s16 = sshll.u32 %s244_s1, 4  ;;  %s17_s13 = int_to_ptr.vmem [resolvable:$true] %s16_s13  ;;  %s28_s16 = int_to_ptr.hbm [resolvable:$true] %s27_s16 }
   0x4   :  { %s215_s17 = smov 128   ;;  %s216_s18 = smov 8  }
   0x5   :  { %22 = dma.hbm_to_vmem [thread:$0]  %s15_s11, 256, %s17_s13, [#allocation6], %s215_s17, %s215_s17, %s216_s18  }
   0x6   :  { %s217_s19 = smov [#allocation8]  }
   0x7   :  { %s29_s20 = sshll.u32 %s217_s19, 4  ;;  %s30_s20 = int_to_ptr.vmem [resolvable:$true] %s29_s20 }
   0x8   :  { %35 = dma.hbm_to_vmem [thread:$0]  %s28_s16, 256, %s30_s20, [#allocation9], %s215_s17, %s215_s17, %s216_s18  }
   0x9   :  { %208 = dma.done.wait [#allocation6], 256  }
   0xa   :  { %209 = vsyncadd [#allocation6], 4294967040 }
   0xb   :  { %210 = dma.done.wait [#allocation9], 256  }
   0xc   :  { %211 = vsyncadd [#allocation9], 4294967040  ;;  %v51_v0 = vld [vmem:[#allocation5] sm:$0xff]  ;;  %v52_v1 = vld [vmem:[#allocation5 + $0x8] sm:$0xff]  ;;  %s121_s22 = sshll.u32 %s245_s2, 4  ;;  %s218_s25 = smov [#allocation10]   ;;  %s122_s22 = int_to_ptr.hbm [resolvable:$true] %s121_s22 }
   0xd   :  { %v53_v2 = vmul.f32 0.5, %v51_v0  ;;  %v54_v3 = vmul.f32 0.5, %v52_v1  ;;  %v61_v4 = vld [vmem:[#allocation8] sm:$0xff]  ;;  %v62_v5 = vld [vmem:[#allocation8 + $0x8] sm:$0xff] }
   0xe   :  { %v74_v6 = vadd.f32 %v62_v5, %v61_v4 }
   0xf   :  { %144 = vtanh.f32 %v53_v2 }
  0x10   :  { %146 = vtanh.f32 %v54_v3  ;;  %105 = vadd.xlane.f32.xlu1 %v74_v6 }
  0x15   :  { %v145_v7 = vpop.eup %144 }
  0x16   :  { %v147_v8 = vpop.eup %146  ;;  %v57_v9 = vadd.f32 1.0, %v145_v7 }
  0x17   :  { %v58_v10 = vadd.f32 1.0, %v147_v8 }
  0x18   :  { %v59_v11 = vmul.f32 0.5, %v57_v9 }
  0x19   :  { %v60_v12 = vmul.f32 0.5, %v58_v10 }
  0x1a   :  { %v64_v13 = vmul.f32 %v61_v4, %v59_v11 }
  0x1b   :  { %v65_v14 = vmul.f32 %v62_v5, %v60_v12  ;;  %v70_v16 = vadd.f32 %v60_v12, %v59_v11 }
  0x1d   :  { %v66_v15 = vadd.f32 %v65_v14, %v64_v13 }
  0x1f   :  { %81 = vadd.xlane.f32.xlu0 %v66_v15 }
  0x27   :  { %93 = vadd.xlane.f32.xlu0 %v70_v16 }
  0x83   :  { %v106_v17 = vpop.xlane.xlu1 %105 }
  0x84   :  { %v107_v19 = vrot.slane %v106_v17, 4 }
  0x86   :  { %v108_v22 = vadd.f32 %v107_v19, %v106_v17 }
  0x88   :  { %v109_v25 = vrot.slane %v108_v22, 2 }
  0x8a   :  { %v110_v31 = vadd.f32 %v109_v25, %v108_v22 }
  0x8c   :  { %v111_v34 = vrot.slane %v110_v31, 1 }
  0x8e   :  { %v112_v37 = vadd.f32 %v111_v34, %v110_v31 }
  0x92   :  { %v82_v18 = vpop.xlane.xlu0 %81 }
  0x93   :  { %v83_v20 = vrot.slane %v82_v18, 4 }
  0x95   :  { %v84_v21 = vadd.f32 %v83_v20, %v82_v18 }
  0x97   :  { %v85_v23 = vrot.slane %v84_v21, 2 }
  0x99   :  { %v86_v24 = vadd.f32 %v85_v23, %v84_v21 }
  0x9a   :  { %v94_v26 = vpop.xlane.xlu0 %93 }
  0x9b   :  { %v95_v27 = vrot.slane %v94_v26, 4  ;;  %v87_v28 = vrot.slane %v86_v24, 1 }
  0x9d   :  { %v96_v29 = vadd.f32 %v95_v27, %v94_v26  ;;  %v88_v30 = vadd.f32 %v87_v28, %v86_v24 }
  0x9f   :  { %v97_v32 = vrot.slane %v96_v29, 2  ;;  %133 = vpush %v88_v30 }
  0xa1   :  { %v98_v33 = vadd.f32 %v97_v32, %v96_v29 }
  0xa3   :  { %v99_v35 = vrot.slane %v98_v33, 1 }
  0xa5   :  { %v100_v36 = vadd.f32 %v99_v35, %v98_v33 }
  0xa7   :  { %135 = vpush %v100_v36 }
  0xa8   :  { %137 = vpush %v112_v37 }
  0xd0   :  { %s134_s0 = spop %133 }
  0xd1   :  { %91 = sst [smem:[#allocation10]] %s134_s0 }
  0xd8   :  { %s136_s23 = spop %135 }
  0xd9   :  { %103 = sst [smem:[#allocation10 + $0x1]] %s136_s23  ;;  %s138_s24 = spop %137 }
  0xda   :  { %115 = sst [smem:[#allocation10 + $0x2]] %s138_s24 }
  0xdb   :  { %124 = dma.smem_to_hbm %s218_s25, 16, %s122_s22, [#allocation7]  }
  0xdc   :  { %212 = dma.done.wait [#allocation7], 16  }
  0xdd   :  { %213 = vsyncadd [#allocation7], 4294967280 }
  0xde   :  { %129 = sfence }
  0xdf   :  { %130 = vsyncpa [#allocation6], 1 }
  0xe0   :  { %131 = vsyncpa [#allocation9], 1 }
  0xe1   :  { %132 = vsyncpa [#allocation7], 1 }

</bundles_post_ra>
